<compile_context>
chip_gen: v6e
topology: v6e:2x2x1
jax: 0.10.0
libtpu: 0.0.40
codegen_flags: <defaults>
</compile_context>

<pallas_src>
import jax
import jax.numpy as jnp
from jax import lax
from jax.experimental import pallas as pl
from jax.experimental.pallas import tpu as pltpu

_TARGET_BLOCK_BYTES = 2 * 1024 * 1024     # ~2 MiB goals block (v7x-safe, low per-step overhead)

# Disjoint stream tags for the two outputs.
_GOALS_STREAM = 0x1234567
_PRIO_STREAM = 0x7654321

# lowbias32 multipliers, expressed as in-range int32 two's-complement literals.
_H_M1 = 0x7FEB352D                        # positive, fits int32
_H_M2 = 0x846CA68B - (1 << 32)            # negative int32 with the same bits


def _hash32(x):
    """lowbias32 integer finalizer (good avalanche); int32 wrap-around math."""
    x = x ^ lax.shift_right_logical(x, 16)
    x = x * _H_M1
    x = x ^ lax.shift_right_logical(x, 15)
    x = x * _H_M2
    x = x ^ lax.shift_right_logical(x, 16)
    return x


def _uniform_from_bits(bits):
    """Map hashed int32 bits to a float32 uniform strictly inside (0, 1)."""
    mant = lax.shift_right_logical(bits, 9)            # 23 bits, >= 0
    return (mant.astype(jnp.float32) + 0.5) * jnp.float32(1.0 / (1 << 23))


def _norm_inv_cdf(u):
    """Beasley-Springer-Moro inverse normal CDF, sign-folded + approx recip."""
    a0, a1, a2, a3 = 2.50662823884, -18.61500062529, 41.39119773534, -25.44106049637
    b0, b1, b2, b3 = -8.47351093090, 23.08336743743, -21.06224101826, 3.13082909833
    c = (0.3374754822726147, 0.9761690190917186, 0.1607979714918209,
         0.0276438810333863, 0.0038405729373609, 0.0003951896511919,
         0.0000321767881768, 0.0000002888167364, 0.0000003960315187)
    y = u - 0.5
    ay = jnp.abs(y)
    r = y * y
    num = ((a3 * r + a2) * r + a1) * r + a0
    den = (((b3 * r + b2) * r + b1) * r + b0) * r + 1.0
    # Divide -> EUP approx reciprocal (off the saturated VALU slot).
    central_abs = ay * num * pl.reciprocal(den, approx=True)
    q = 0.5 - ay                                       # = min(u, 1-u) in (0, 0.5]
    s = jnp.log(-jnp.log(q))
    tail_abs = c[8]
    for ci in reversed(c[:-1]):
        tail_abs = tail_abs * s + ci
    z_abs = jnp.where(ay < 0.42, central_abs, tail_abs)
    return jnp.where(y < 0.0, -z_abs, z_abs)


def _randn_from_ctr(ctr, stream_seed):
    """i.i.d. ~N(0,1) float32 values from int32 counters + scalar stream seed."""
    seed_mix = _hash32(stream_seed)                    # scalar mix, once
    bits = _hash32(ctr ^ seed_mix)                     # one vector hash round/elem
    return _norm_inv_cdf(_uniform_from_bits(bits))


def _goal_gen_kernel(seed_ref, goals_ref, prio_ref):
    seed = seed_ref[0]

    # ---- goals tile: (tile_rows, hidden_dim) of i.i.d. N(0,1) --------------
    tile_rows, h = goals_ref.shape
    base = pl.program_id(0) * (tile_rows * h)          # scalar flat offset of tile
    row = lax.broadcasted_iota(jnp.int32, (tile_rows, h), 0)
    col = lax.broadcasted_iota(jnp.int32, (tile_rows, h), 1)
    ctr = base + row * h + col                         # global flat element index
    goals_ref[...] = _randn_from_ctr(ctr, seed + _GOALS_STREAM)

    # ---- priorities: softmax(randn(B, G)), deterministic from the seed -----
    # Recomputed identically (idempotent write) by every grid step, so the
    # separate launch is gone and there is no cross-step/core ordering hazard.
    b, g = prio_ref.shape
    prow = lax.broadcasted_iota(jnp.int32, (b, g), 0)
    pcol = lax.broadcasted_iota(jnp.int32, (b, g), 1)
    raw = _randn_from_ctr(prow * g + pcol, seed + _PRIO_STREAM)
    m = jnp.max(raw, axis=-1, keepdims=True)
    e = jnp.exp(raw - m)
    prio_ref[...] = e / jnp.sum(e, axis=-1, keepdims=True)   # exact divide: tiny block


def _round_up(v, m):
    return ((v + m - 1) // m) * m


def goal_generator(x, hidden_dim: int, num_goals: int, seed: int = 0):
    """Pallas implementation of GoalGenerator.forward.

    Returns (goals, priorities):
      goals:      (B, num_goals, hidden_dim) float32, ~N(0, 1)
      priorities: (B, num_goals)             float32, rows sum to 1.
    """
    batch = x.shape[0]
    rows = batch * num_goals
    if rows * hidden_dim >= 2 ** 31:
        raise ValueError("goal tensor too large for the int32 counter stream")

    # Row tiling: ~2 MiB per goals block; force >= 2 tiles when possible so the
    # 'parallel' row axis can be split across both v7x TensorCores.
    cap_rows = max(8, (_TARGET_BLOCK_BYTES // (4 * hidden_dim)) // 8 * 8)
    if rows <= 8:
        tile_rows = rows                               # single full-extent block
    else:
        tile_rows = min(cap_rows, _round_up((rows + 1) // 2, 8))
    num_tiles = (rows + tile_rows - 1) // tile_rows

    seed_arr = jnp.asarray([seed], dtype=jnp.int32)

    goals_flat, priorities = pl.pallas_call(
        _goal_gen_kernel,
        out_shape=(
            jax.ShapeDtypeStruct((rows, hidden_dim), jnp.float32),
            jax.ShapeDtypeStruct((batch, num_goals), jnp.float32),
        ),
        grid=(num_tiles,),
        in_specs=[pl.BlockSpec(memory_space=pltpu.MemorySpace.SMEM)],
        out_specs=(
            pl.BlockSpec((tile_rows, hidden_dim), lambda i: (i, 0)),
            pl.BlockSpec((batch, num_goals), lambda i: (0, 0)),
        ),
        compiler_params=pltpu.CompilerParams(
            dimension_semantics=("parallel",)),
    )(seed_arr)

    # Leading-dim split only: free, no relayout of the minor (lane) dimension.
    goals = goals_flat.reshape(batch, num_goals, hidden_dim)
    return goals, priorities


if __name__ == "__main__":
    # Small shapes consistent with the module: batch=2, hidden_dim=32, num_goals=8.
    hidden_dim = 32
    num_goals = 8
    batch = 2

    key = jax.random.PRNGKey(0)
    # x is only used for its batch dimension (as in the torch module).
    x = jax.random.normal(key, (batch, hidden_dim), dtype=jnp.float32)

    goals, priorities = goal_generator(x, hidden_dim, num_goals, seed=0)
    goals = jax.block_until_ready(goals)
    priorities = jax.block_until_ready(priorities)

    # Sanity checks: shapes, finiteness, softmax normalization.
    assert goals.shape == (batch, num_goals, hidden_dim)
    assert priorities.shape == (batch, num_goals)
    assert bool(jnp.all(jnp.isfinite(goals)))
    assert bool(jnp.all(jnp.isfinite(priorities)))
    assert bool(jnp.all(jnp.abs(jnp.sum(priorities, axis=-1) - 1.0) < 1e-5))

    print("KERNEL_OK")
</pallas_src>

<mosaic_0001>
module attributes {stable_mosaic.version = 11 : i64} {
  func.func @_goal_gen_kernel(%arg0: i32, %arg1: memref<1xi32, #tpu.memory_space<smem>>, %arg2: memref<8x32xf32, #tpu.memory_space<vmem>>, %arg3: memref<2x8xf32, #tpu.memory_space<vmem>>) attributes {dimension_semantics = [#tpu.dimension_semantics<parallel>], iteration_bounds = array<i64: 2>, scalar_prefetch = 0 : i64, scratch_operands = 0 : i64, tpu.core_type = #tpu.core_type<tc>, window_params = [{transform_indices = @transform_0, window_bounds = array<i64: 1>}, {transform_indices = @transform_1, window_bounds = array<i64: 8, 32>}, {pipeline_mode = #tpu.pipeline_mode<synchronous>, transform_indices = @transform_2, window_bounds = array<i64: 2, 8>}]} {
    %c0 = arith.constant 0 : index
    %0 = memref.load %arg1[%c0] : memref<1xi32, #tpu.memory_space<smem>>
    %c256_i32 = arith.constant 256 : i32
    %1 = arith.muli %arg0, %c256_i32 : i32
    %2 = tpu.iota {dimensions = array<i32: 0>} : vector<8x32xi32>
    %3 = tpu.iota {dimensions = array<i32: 1>} : vector<8x32xi32>
    %c32_i32 = arith.constant 32 : i32
    %4 = vector.broadcast %c32_i32 : i32 to vector<8x32xi32>
    %5 = arith.muli %2, %4 : vector<8x32xi32>
    %6 = vector.broadcast %1 : i32 to vector<8x32xi32>
    %7 = arith.addi %6, %5 : vector<8x32xi32>
    %8 = arith.addi %7, %3 : vector<8x32xi32>
    %c19088743_i32 = arith.constant 19088743 : i32
    %9 = arith.addi %0, %c19088743_i32 : i32
    %c16_i32 = arith.constant 16 : i32
    %10 = arith.shrui %9, %c16_i32 : i32
    %11 = arith.xori %9, %10 : i32
    %c2146121005_i32 = arith.constant 2146121005 : i32
    %12 = arith.muli %11, %c2146121005_i32 : i32
    %c15_i32 = arith.constant 15 : i32
    %13 = arith.shrui %12, %c15_i32 : i32
    %14 = arith.xori %12, %13 : i32
    %c-2073254261_i32 = arith.constant -2073254261 : i32
    %15 = arith.muli %14, %c-2073254261_i32 : i32
    %c16_i32_0 = arith.constant 16 : i32
    %16 = arith.shrui %15, %c16_i32_0 : i32
    %17 = arith.xori %15, %16 : i32
    %18 = vector.broadcast %17 : i32 to vector<8x32xi32>
    %19 = arith.xori %8, %18 : vector<8x32xi32>
    %c16_i32_1 = arith.constant 16 : i32
    %20 = vector.broadcast %c16_i32_1 : i32 to vector<8x32xi32>
    %21 = arith.shrui %19, %20 : vector<8x32xi32>
    %22 = arith.xori %19, %21 : vector<8x32xi32>
    %c2146121005_i32_2 = arith.constant 2146121005 : i32
    %23 = vector.broadcast %c2146121005_i32_2 : i32 to vector<8x32xi32>
    %24 = arith.muli %22, %23 : vector<8x32xi32>
    %c15_i32_3 = arith.constant 15 : i32
    %25 = vector.broadcast %c15_i32_3 : i32 to vector<8x32xi32>
    %26 = arith.shrui %24, %25 : vector<8x32xi32>
    %27 = arith.xori %24, %26 : vector<8x32xi32>
    %c-2073254261_i32_4 = arith.constant -2073254261 : i32
    %28 = vector.broadcast %c-2073254261_i32_4 : i32 to vector<8x32xi32>
    %29 = arith.muli %27, %28 : vector<8x32xi32>
    %c16_i32_5 = arith.constant 16 : i32
    %30 = vector.broadcast %c16_i32_5 : i32 to vector<8x32xi32>
    %31 = arith.shrui %29, %30 : vector<8x32xi32>
    %32 = arith.xori %29, %31 : vector<8x32xi32>
    %c9_i32 = arith.constant 9 : i32
    %33 = vector.broadcast %c9_i32 : i32 to vector<8x32xi32>
    %34 = arith.shrui %32, %33 : vector<8x32xi32>
    %35 = arith.sitofp %34 : vector<8x32xi32> to vector<8x32xf32>
    %cst = arith.constant 5.000000e-01 : f32
    %36 = vector.broadcast %cst : f32 to vector<8x32xf32>
    %37 = arith.addf %35, %36 : vector<8x32xf32>
    %cst_6 = arith.constant 1.1920929E-7 : f32
    %38 = vector.broadcast %cst_6 : f32 to vector<8x32xf32>
    %39 = arith.mulf %37, %38 : vector<8x32xf32>
    %cst_7 = arith.constant 5.000000e-01 : f32
    %40 = vector.broadcast %cst_7 : f32 to vector<8x32xf32>
    %41 = arith.subf %39, %40 : vector<8x32xf32>
    %42 = math.absf %41 : vector<8x32xf32>
    %43 = arith.mulf %41, %41 : vector<8x32xf32>
    %cst_8 = arith.constant -25.441061 : f32
    %44 = vector.broadcast %cst_8 : f32 to vector<8x32xf32>
    %45 = arith.mulf %44, %43 : vector<8x32xf32>
    %cst_9 = arith.constant 41.3911972 : f32
    %46 = vector.broadcast %cst_9 : f32 to vector<8x32xf32>
    %47 = arith.addf %45, %46 : vector<8x32xf32>
    %48 = arith.mulf %47, %43 : vector<8x32xf32>
    %cst_10 = arith.constant -1.861500e+01 : f32
    %49 = vector.broadcast %cst_10 : f32 to vector<8x32xf32>
    %50 = arith.addf %48, %49 : vector<8x32xf32>
    %51 = arith.mulf %50, %43 : vector<8x32xf32>
    %cst_11 = arith.constant 2.50662827 : f32
    %52 = vector.broadcast %cst_11 : f32 to vector<8x32xf32>
    %53 = arith.addf %51, %52 : vector<8x32xf32>
    %cst_12 = arith.constant 3.1308291 : f32
    %54 = vector.broadcast %cst_12 : f32 to vector<8x32xf32>
    %55 = arith.mulf %54, %43 : vector<8x32xf32>
    %cst_13 = arith.constant -21.0622406 : f32
    %56 = vector.broadcast %cst_13 : f32 to vector<8x32xf32>
    %57 = arith.addf %55, %56 : vector<8x32xf32>
    %58 = arith.mulf %57, %43 : vector<8x32xf32>
    %cst_14 = arith.constant 23.0833683 : f32
    %59 = vector.broadcast %cst_14 : f32 to vector<8x32xf32>
    %60 = arith.addf %58, %59 : vector<8x32xf32>
    %61 = arith.mulf %60, %43 : vector<8x32xf32>
    %cst_15 = arith.constant -8.47351074 : f32
    %62 = vector.broadcast %cst_15 : f32 to vector<8x32xf32>
    %63 = arith.addf %61, %62 : vector<8x32xf32>
    %64 = arith.mulf %63, %43 : vector<8x32xf32>
    %cst_16 = arith.constant 1.000000e+00 : f32
    %65 = vector.broadcast %cst_16 : f32 to vector<8x32xf32>
    %66 = arith.addf %64, %65 : vector<8x32xf32>
    %67 = arith.mulf %42, %53 : vector<8x32xf32>
    %68 = tpu.reciprocal %66 {approx = true} : vector<8x32xf32> -> vector<8x32xf32>
    %69 = arith.mulf %67, %68 : vector<8x32xf32>
    %cst_17 = arith.constant 5.000000e-01 : f32
    %70 = vector.broadcast %cst_17 : f32 to vector<8x32xf32>
    %71 = arith.subf %70, %42 : vector<8x32xf32>
    %72 = math.log %71 : vector<8x32xf32>
    %cst_18 = arith.constant 0.000000e+00 : f32
    %73 = vector.broadcast %cst_18 : f32 to vector<8x32xf32>
    %74 = arith.subf %73, %72 : vector<8x32xf32>
    %75 = math.log %74 : vector<8x32xf32>
    %cst_19 = arith.constant 3.9603151E-7 : f32
    %76 = vector.broadcast %cst_19 : f32 to vector<8x32xf32>
    %77 = arith.mulf %76, %75 : vector<8x32xf32>
    %cst_20 = arith.constant 2.8881675E-7 : f32
    %78 = vector.broadcast %cst_20 : f32 to vector<8x32xf32>
    %79 = arith.addf %77, %78 : vector<8x32xf32>
    %80 = arith.mulf %79, %75 : vector<8x32xf32>
    %cst_21 = arith.constant 3.21767875E-5 : f32
    %81 = vector.broadcast %cst_21 : f32 to vector<8x32xf32>
    %82 = arith.addf %80, %81 : vector<8x32xf32>
    %83 = arith.mulf %82, %75 : vector<8x32xf32>
    %cst_22 = arith.constant 3.95189651E-4 : f32
    %84 = vector.broadcast %cst_22 : f32 to vector<8x32xf32>
    %85 = arith.addf %83, %84 : vector<8x32xf32>
    %86 = arith.mulf %85, %75 : vector<8x32xf32>
    %cst_23 = arith.constant 0.0038405729 : f32
    %87 = vector.broadcast %cst_23 : f32 to vector<8x32xf32>
    %88 = arith.addf %86, %87 : vector<8x32xf32>
    %89 = arith.mulf %88, %75 : vector<8x32xf32>
    %cst_24 = arith.constant 0.0276438817 : f32
    %90 = vector.broadcast %cst_24 : f32 to vector<8x32xf32>
    %91 = arith.addf %89, %90 : vector<8x32xf32>
    %92 = arith.mulf %91, %75 : vector<8x32xf32>
    %cst_25 = arith.constant 0.160797969 : f32
    %93 = vector.broadcast %cst_25 : f32 to vector<8x32xf32>
    %94 = arith.addf %92, %93 : vector<8x32xf32>
    %95 = arith.mulf %94, %75 : vector<8x32xf32>
    %cst_26 = arith.constant 0.97616899 : f32
    %96 = vector.broadcast %cst_26 : f32 to vector<8x32xf32>
    %97 = arith.addf %95, %96 : vector<8x32xf32>
    %98 = arith.mulf %97, %75 : vector<8x32xf32>
    %cst_27 = arith.constant 0.337475479 : f32
    %99 = vector.broadcast %cst_27 : f32 to vector<8x32xf32>
    %100 = arith.addf %98, %99 : vector<8x32xf32>
    %cst_28 = arith.constant 4.200000e-01 : f32
    %101 = vector.broadcast %cst_28 : f32 to vector<8x32xf32>
    %102 = arith.cmpf olt, %42, %101 : vector<8x32xf32>
    %103 = arith.select %102, %69, %100 : vector<8x32xi1>, vector<8x32xf32>
    %cst_29 = arith.constant 0.000000e+00 : f32
    %104 = vector.broadcast %cst_29 : f32 to vector<8x32xf32>
    %105 = arith.cmpf olt, %41, %104 : vector<8x32xf32>
    %cst_30 = arith.constant 0.000000e+00 : f32
    %106 = vector.broadcast %cst_30 : f32 to vector<8x32xf32>
    %107 = arith.subf %106, %103 : vector<8x32xf32>
    %108 = arith.select %105, %107, %103 : vector<8x32xi1>, vector<8x32xf32>
    %c0_31 = arith.constant 0 : index
    %c0_32 = arith.constant 0 : index
    %109 = vector.load %arg2[%c0_31, %c0_32] : memref<8x32xf32, #tpu.memory_space<vmem>>, vector<8x32xf32>
    tpu.vector_store %arg2[%c0_31, %c0_32], %108 {strides = array<i32>} : memref<8x32xf32, #tpu.memory_space<vmem>>, vector<8x32xf32>,
    %110 = tpu.iota {dimensions = array<i32: 0>} : vector<2x8xi32>
    %111 = tpu.iota {dimensions = array<i32: 1>} : vector<2x8xi32>
    %c8_i32 = arith.constant 8 : i32
    %112 = vector.broadcast %c8_i32 : i32 to vector<2x8xi32>
    %113 = arith.muli %110, %112 : vector<2x8xi32>
    %114 = arith.addi %113, %111 : vector<2x8xi32>
    %c124076833_i32 = arith.constant 124076833 : i32
    %115 = arith.addi %0, %c124076833_i32 : i32
    %c16_i32_33 = arith.constant 16 : i32
    %116 = arith.shrui %115, %c16_i32_33 : i32
    %117 = arith.xori %115, %116 : i32
    %c2146121005_i32_34 = arith.constant 2146121005 : i32
    %118 = arith.muli %117, %c2146121005_i32_34 : i32
    %c15_i32_35 = arith.constant 15 : i32
    %119 = arith.shrui %118, %c15_i32_35 : i32
    %120 = arith.xori %118, %119 : i32
    %c-2073254261_i32_36 = arith.constant -2073254261 : i32
    %121 = arith.muli %120, %c-2073254261_i32_36 : i32
    %c16_i32_37 = arith.constant 16 : i32
    %122 = arith.shrui %121, %c16_i32_37 : i32
    %123 = arith.xori %121, %122 : i32
    %124 = vector.broadcast %123 : i32 to vector<2x8xi32>
    %125 = arith.xori %114, %124 : vector<2x8xi32>
    %c16_i32_38 = arith.constant 16 : i32
    %126 = vector.broadcast %c16_i32_38 : i32 to vector<2x8xi32>
    %127 = arith.shrui %125, %126 : vector<2x8xi32>
    %128 = arith.xori %125, %127 : vector<2x8xi32>
    %c2146121005_i32_39 = arith.constant 2146121005 : i32
    %129 = vector.broadcast %c2146121005_i32_39 : i32 to vector<2x8xi32>
    %130 = arith.muli %128, %129 : vector<2x8xi32>
    %c15_i32_40 = arith.constant 15 : i32
    %131 = vector.broadcast %c15_i32_40 : i32 to vector<2x8xi32>
    %132 = arith.shrui %130, %131 : vector<2x8xi32>
    %133 = arith.xori %130, %132 : vector<2x8xi32>
    %c-2073254261_i32_41 = arith.constant -2073254261 : i32
    %134 = vector.broadcast %c-2073254261_i32_41 : i32 to vector<2x8xi32>
    %135 = arith.muli %133, %134 : vector<2x8xi32>
    %c16_i32_42 = arith.constant 16 : i32
    %136 = vector.broadcast %c16_i32_42 : i32 to vector<2x8xi32>
    %137 = arith.shrui %135, %136 : vector<2x8xi32>
    %138 = arith.xori %135, %137 : vector<2x8xi32>
    %c9_i32_43 = arith.constant 9 : i32
    %139 = vector.broadcast %c9_i32_43 : i32 to vector<2x8xi32>
    %140 = arith.shrui %138, %139 : vector<2x8xi32>
    %141 = arith.sitofp %140 : vector<2x8xi32> to vector<2x8xf32>
    %cst_44 = arith.constant 5.000000e-01 : f32
    %142 = vector.broadcast %cst_44 : f32 to vector<2x8xf32>
    %143 = arith.addf %141, %142 : vector<2x8xf32>
    %cst_45 = arith.constant 1.1920929E-7 : f32
    %144 = vector.broadcast %cst_45 : f32 to vector<2x8xf32>
    %145 = arith.mulf %143, %144 : vector<2x8xf32>
    %cst_46 = arith.constant 5.000000e-01 : f32
    %146 = vector.broadcast %cst_46 : f32 to vector<2x8xf32>
    %147 = arith.subf %145, %146 : vector<2x8xf32>
    %148 = math.absf %147 : vector<2x8xf32>
    %149 = arith.mulf %147, %147 : vector<2x8xf32>
    %cst_47 = arith.constant -25.441061 : f32
    %150 = vector.broadcast %cst_47 : f32 to vector<2x8xf32>
    %151 = arith.mulf %150, %149 : vector<2x8xf32>
    %cst_48 = arith.constant 41.3911972 : f32
    %152 = vector.broadcast %cst_48 : f32 to vector<2x8xf32>
    %153 = arith.addf %151, %152 : vector<2x8xf32>
    %154 = arith.mulf %153, %149 : vector<2x8xf32>
    %cst_49 = arith.constant -1.861500e+01 : f32
    %155 = vector.broadcast %cst_49 : f32 to vector<2x8xf32>
    %156 = arith.addf %154, %155 : vector<2x8xf32>
    %157 = arith.mulf %156, %149 : vector<2x8xf32>
    %cst_50 = arith.constant 2.50662827 : f32
    %158 = vector.broadcast %cst_50 : f32 to vector<2x8xf32>
    %159 = arith.addf %157, %158 : vector<2x8xf32>
    %cst_51 = arith.constant 3.1308291 : f32
    %160 = vector.broadcast %cst_51 : f32 to vector<2x8xf32>
    %161 = arith.mulf %160, %149 : vector<2x8xf32>
    %cst_52 = arith.constant -21.0622406 : f32
    %162 = vector.broadcast %cst_52 : f32 to vector<2x8xf32>
    %163 = arith.addf %161, %162 : vector<2x8xf32>
    %164 = arith.mulf %163, %149 : vector<2x8xf32>
    %cst_53 = arith.constant 23.0833683 : f32
    %165 = vector.broadcast %cst_53 : f32 to vector<2x8xf32>
    %166 = arith.addf %164, %165 : vector<2x8xf32>
    %167 = arith.mulf %166, %149 : vector<2x8xf32>
    %cst_54 = arith.constant -8.47351074 : f32
    %168 = vector.broadcast %cst_54 : f32 to vector<2x8xf32>
    %169 = arith.addf %167, %168 : vector<2x8xf32>
    %170 = arith.mulf %169, %149 : vector<2x8xf32>
    %cst_55 = arith.constant 1.000000e+00 : f32
    %171 = vector.broadcast %cst_55 : f32 to vector<2x8xf32>
    %172 = arith.addf %170, %171 : vector<2x8xf32>
    %173 = arith.mulf %148, %159 : vector<2x8xf32>
    %174 = tpu.reciprocal %172 {approx = true} : vector<2x8xf32> -> vector<2x8xf32>
    %175 = arith.mulf %173, %174 : vector<2x8xf32>
    %cst_56 = arith.constant 5.000000e-01 : f32
    %176 = vector.broadcast %cst_56 : f32 to vector<2x8xf32>
    %177 = arith.subf %176, %148 : vector<2x8xf32>
    %178 = math.log %177 : vector<2x8xf32>
    %cst_57 = arith.constant 0.000000e+00 : f32
    %179 = vector.broadcast %cst_57 : f32 to vector<2x8xf32>
    %180 = arith.subf %179, %178 : vector<2x8xf32>
    %181 = math.log %180 : vector<2x8xf32>
    %cst_58 = arith.constant 3.9603151E-7 : f32
    %182 = vector.broadcast %cst_58 : f32 to vector<2x8xf32>
    %183 = arith.mulf %182, %181 : vector<2x8xf32>
    %cst_59 = arith.constant 2.8881675E-7 : f32
    %184 = vector.broadcast %cst_59 : f32 to vector<2x8xf32>
    %185 = arith.addf %183, %184 : vector<2x8xf32>
    %186 = arith.mulf %185, %181 : vector<2x8xf32>
    %cst_60 = arith.constant 3.21767875E-5 : f32
    %187 = vector.broadcast %cst_60 : f32 to vector<2x8xf32>
    %188 = arith.addf %186, %187 : vector<2x8xf32>
    %189 = arith.mulf %188, %181 : vector<2x8xf32>
    %cst_61 = arith.constant 3.95189651E-4 : f32
    %190 = vector.broadcast %cst_61 : f32 to vector<2x8xf32>
    %191 = arith.addf %189, %190 : vector<2x8xf32>
    %192 = arith.mulf %191, %181 : vector<2x8xf32>
    %cst_62 = arith.constant 0.0038405729 : f32
    %193 = vector.broadcast %cst_62 : f32 to vector<2x8xf32>
    %194 = arith.addf %192, %193 : vector<2x8xf32>
    %195 = arith.mulf %194, %181 : vector<2x8xf32>
    %cst_63 = arith.constant 0.0276438817 : f32
    %196 = vector.broadcast %cst_63 : f32 to vector<2x8xf32>
    %197 = arith.addf %195, %196 : vector<2x8xf32>
    %198 = arith.mulf %197, %181 : vector<2x8xf32>
    %cst_64 = arith.constant 0.160797969 : f32
    %199 = vector.broadcast %cst_64 : f32 to vector<2x8xf32>
    %200 = arith.addf %198, %199 : vector<2x8xf32>
    %201 = arith.mulf %200, %181 : vector<2x8xf32>
    %cst_65 = arith.constant 0.97616899 : f32
    %202 = vector.broadcast %cst_65 : f32 to vector<2x8xf32>
    %203 = arith.addf %201, %202 : vector<2x8xf32>
    %204 = arith.mulf %203, %181 : vector<2x8xf32>
    %cst_66 = arith.constant 0.337475479 : f32
    %205 = vector.broadcast %cst_66 : f32 to vector<2x8xf32>
    %206 = arith.addf %204, %205 : vector<2x8xf32>
    %cst_67 = arith.constant 4.200000e-01 : f32
    %207 = vector.broadcast %cst_67 : f32 to vector<2x8xf32>
    %208 = arith.cmpf olt, %148, %207 : vector<2x8xf32>
    %209 = arith.select %208, %175, %206 : vector<2x8xi1>, vector<2x8xf32>
    %cst_68 = arith.constant 0.000000e+00 : f32
    %210 = vector.broadcast %cst_68 : f32 to vector<2x8xf32>
    %211 = arith.cmpf olt, %147, %210 : vector<2x8xf32>
    %cst_69 = arith.constant 0.000000e+00 : f32
    %212 = vector.broadcast %cst_69 : f32 to vector<2x8xf32>
    %213 = arith.subf %212, %209 : vector<2x8xf32>
    %214 = arith.select %211, %213, %209 : vector<2x8xi1>, vector<2x8xf32>
    %cst_70 = arith.constant dense<0xFF800000> : vector<2xf32>
    %215 = vector.multi_reduction <maximumf>, %214, %cst_70 [1] : vector<2x8xf32> to vector<2xf32>
    %216 = vector.shape_cast %215 : vector<2xf32> to vector<2x1xf32>
    %217 = vector.broadcast %216 : vector<2x1xf32> to vector<2x8xf32>
    %218 = arith.subf %214, %217 : vector<2x8xf32>
    %219 = math.exp %218 : vector<2x8xf32>
    %cst_71 = arith.constant dense<0.000000e+00> : vector<2xf32>
    %220 = vector.multi_reduction <add>, %219, %cst_71 [1] : vector<2x8xf32> to vector<2xf32>
    %221 = vector.shape_cast %220 : vector<2xf32> to vector<2x1xf32>
    %222 = vector.broadcast %221 : vector<2x1xf32> to vector<2x8xf32>
    %223 = arith.divf %219, %222 : vector<2x8xf32>
    %c0_72 = arith.constant 0 : index
    %c0_73 = arith.constant 0 : index
    %224 = vector.load %arg3[%c0_72, %c0_73] : memref<2x8xf32, #tpu.memory_space<vmem>>, vector<2x8xf32>
    tpu.vector_store %arg3[%c0_72, %c0_73], %223 {strides = array<i32>} : memref<2x8xf32, #tpu.memory_space<vmem>>, vector<2x8xf32>,
    return
  }
  func.func @transform_0(%arg0: i32) -> i32 {
    %c0_i32 = arith.constant 0 : i32
    %c0_i32_0 = arith.constant 0 : i32
    return %c0_i32 : i32
  }
  func.func @transform_1(%arg0: i32) -> (i32, i32) {
    %c0_i32 = arith.constant 0 : i32
    %c0_i32_0 = arith.constant 0 : i32
    return %arg0, %c0_i32 : i32, i32
  }
  func.func @transform_2(%arg0: i32) -> (i32, i32) {
    %c0_i32 = arith.constant 0 : i32
    %c0_i32_0 = arith.constant 0 : i32
    %c0_i32_1 = arith.constant 0 : i32
    return %c0_i32, %c0_i32_0 : i32, i32
  }
}

</mosaic_0001>

<bundles_post_ra>
// kernel: tpu_custom_call.1
= control target key start
LH: loop header
LB: loop body
LE: loop exit
PB: predicated region body
PF: predicated region fallthrough
CT: control target
= control target key end

     0   :  { %s679_s0 = inlined_call_operand.<no memory space> [shape: s32[1], index: 0, kind: input, shape index: {}]   ;;  %s680_s1 = inlined_call_operand.hbm [shape: f32[16,32], index: 1, kind: output, shape index: {0}]   ;;  %s681_s2 = inlined_call_operand.hbm [shape: f32[2,8], index: 2, kind: output, shape index: {1}]  }
   0x1   :  { %8 = sst [smem:[#allocation2]] %s679_s0 }
   0x2   :  { %9 = vsyncpa [#allocation4], 0 }
   0x3   :  { %11 = vsyncpa [#allocation4 + $0x1], 0 }
   0x4   :  { %12 = vsyncpa [#allocation6], 0  ;;  %s557_s11 = smov 0   ;;  %s559_s12 = smov 0  }
   0x5   :  { %s561_s13 = smov 0   ;;  %s563_s14 = smov 0  }
   0x6 LB: > { %s578_s0 = sadd.s32 4294967295, %s535_s14   ;;  %s372_s15 = sadd.s32 4294967294, %s535_s14   ;;  %s535_s14 = sphi %s563_s14, %s687_s14   ;;  %s531_s13 = sphi %s561_s13, %s686_s13   ;;  %s527_s12 = sphi %s559_s12, %s685_s12   ;;  %s523_s11 = sphi %s557_s11, %s684_s11  }
   0x7   : > { %s582_s16 = sadd.s32 1, %s535_s14   ;;  %s46_s17 = sadd.s32 1, %s531_s13 }
   0x8   : > { %s43_s18 = ssub.s32 %s535_s14, %s582_s16  ;;  %p56_p0 = scmp.ne.s32.totalorder %s531_s13, %s527_s12 }
   0x9   : > { %p44_p1 = scmp.eq.s32.totalorder %s43_s18, 0  ;;  %p57_p2 = scmp.eq.s32.totalorder %s578_s0, 1 }
   0xa   : > { %p62_p3 = scmp.ne.s32.totalorder %s527_s12, %s523_s11  ;;  %p63_p4 = scmp.eq.s32.totalorder %s372_s15, 1 }
   0xb   : > { %s593_s19 = scalar_select %p44_p1, %s531_s13, %s46_s17  }
   0xc   : > { %p597_p5 = por %p57_p2, %p56_p0  ;;  %p601_p6 = por %p63_p4, %p62_p3 }
   0xd   : > { %p374_p7 = scmp.ge.s32.totalorder %s535_s14, 1  ;;  %p105_p8 = scmp.lt.s32.totalorder %s535_s14, 3 }
   0xf   : > { %p106_p9 = pnand %p374_p7, %p105_p8 }
  0x10   : > { %s607_s22 = sld [smem:[#allocation2]] (!%p106_p9)  ;;  %s376_s23 = sshll.u32 (!%p106_p9), %s578_s0, 8 }
  0x11   : > { %109 = sbr.rel (%p106_p9) target bundleno = 453 (0x1c5), region = 24 }
  0x16   : > { %v124_v0 = vlaneseq  ;;  %v129_v2 = vstv %s376_s23  ;;  %s206_s24 = sadd.s32 124076833, %s607_s22  ;;  %vm276_vm2 = vcmask 58368   ;;  %s132_s5 = sadd.s32 19088743, %s607_s22  ;;  %vm202_vm5 = vcmask 261120  }
  0x17   : > { %s207_s25 = sshrl.u32 %s206_s24, 16  ;;  %s133_s6 = sshrl.u32 %s132_s5, 16 }
  0x18   : > { %v125_v1 = vshrl.u32 %v124_v0, 7  ;;  %v127_v4 = vand.u32 127, %v124_v0  ;;  %s208_s26 = sxor.u32 %s207_s25, %s206_s24  ;;  %s134_s7 = sxor.u32 %s133_s6, %s132_s5 }
  0x19   : > { %s209_s27 = smul.u32 2146121005, %s208_s26  ;;  %s117_s22 = sand.u32 1, %s527_s12  }
  0x1a   : > { %v128_v3 = vmul.u32 32, %v125_v1  ;;  %v204_v7 = vmul.u32 8, %v125_v1  ;;  %s135_s8 = smul.u32 2146121005, %s134_s7  ;;  %s375_s23 = sshll.u32 %s117_s22, 3 }
  0x1b   : > { %s210_s28 = sshrl.u32 %s209_s27, 15  ;;  %s380_s24 = sshll.u32 %s578_s0, 7 }
  0x1c   : > { %v130_v5 = vadd.s32 %v129_v2, %v128_v3  ;;  %s211_s29 = sxor.u32 %s210_s28, %s209_s27  ;;  %v205_v8 = vadd.s32 %v204_v7, %v127_v4  ;;  %s136_s9 = sshrl.u32 %s135_s8, 15 }
  0x1d   : > { %s212_s30 = smul.u32 2221713035, %s211_s29  ;;  %s137_s10 = sxor.u32 %s136_s9, %s135_s8 }
  0x1e   : > { %v611_v6 = vadd.s32 %v130_v5, %v127_v4  ;;  %s138_s15 = smul.u32 2221713035, %s137_s10  ;;  %s119_s25 = scalar_lea.vmem [#allocation3], %s375_s23 }
  0x1f   : > { %s213_s3 = sshrl.u32 %s212_s30, 16  ;;  %s303_s26 = sshll.u32 %s119_s25, 4  ;;  %s304_s26 = int_to_ptr.vmem [resolvable:$true] %s303_s26 }
  0x20   : > { %s214_s4 = sxor.u32 %s213_s3, %s212_s30  ;;  %s139_s17 = sshrl.u32 %s138_s15, 16 }
  0x21   : > { %v215_v9 = vstv %s214_s4  ;;  %s140_s18 = sxor.u32 %s139_s17, %s138_s15  ;;  %s631_s29 = scalar_lea.hbm %s680_s1, %s380_s24 }
  0x22   : > { %v216_v10 = vxor.u32 %v215_v9, %v205_v8  ;;  %v141_v5 = vstv %s140_s18  ;;  %s290_s30 = scalar_lea.sflag [#allocation4], %s117_s22  ;;  %s447_s3 = scalar_lea.vmem %s304_s26, 128 }
  0x23   : > { %v142_v7 = vxor.u32 %v141_v5, %v611_v6  ;;  %p448_p10 = scmp.ne.s32.totalorder %s304_s26, %s447_s3  ;;  %s537_s4 = smov [#allocation3]  }
  0x24   : > { %v217_v11 = vshrl.u32 %v216_v10, 16  ;;  %s451_s5 = sshll.u32 %s537_s4, 4  ;;  %s452_s5 = int_to_ptr.vmem [resolvable:$false] %s451_s5 }
  0x25   : > { %v143_v8 = vshrl.u32 %v142_v7, 16  ;;  %p449_p11 = pnand %p448_p10, %p597_p5  ;;  %s453_s6 = scalar_lea.vmem %s452_s5, 256 }
  0x26   : > { %v218_v12 = vxor.u32 %v217_v11, %v216_v10  ;;  %p454_p13 = scmp.lt.s32.totalorder %s304_s26, %s452_s5  ;;  %p455_p0 = scmp.lt.s32.totalorder %s453_s6, %s447_s3 }
  0x27   : > { %v144_v9 = vxor.u32 %v143_v8, %v142_v7  ;;  %p450_p12 = pneg %p449_p11 }
  0x28   : > { %v219_v13 = vmul.u32 2146121005, %v218_v12  ;;  %p456_p1 = por %p455_p0, %p454_p13 }
  0x29   : > { %v145_v10 = vmul.u32 2146121005, %v144_v9 }
  0x2a   : > { %v220_v14 = vshrl.u32 %v219_v13, 15  ;;  %p457_p3 = pnand %p456_p1, %p450_p12 }
  0x2b   : > { %v146_v11 = vshrl.u32 %v145_v10, 15 }
  0x2c   : > { %v221_v15 = vxor.u32 %v220_v14, %v219_v13 }
  0x2d   : > { %v147_v12 = vxor.u32 %v146_v11, %v145_v10 }
  0x2e   : > { %v222_v16 = vmul.u32 2221713035, %v221_v15 }
  0x2f   : > { %v148_v13 = vmul.u32 2221713035, %v147_v12 }
  0x30   : > { %v223_v17 = vshrl.u32 %v222_v16, 16 }
  0x31   : > { %v149_v14 = vshrl.u32 %v148_v13, 16 }
  0x32   : > { %v224_v18 = vxor.u32 %v223_v17, %v222_v16 }
  0x33   : > { %v150_v15 = vxor.u32 %v149_v14, %v148_v13 }
  0x34   : > { %v225_v19 = vshrl.u32 %v224_v18, 9 }
  0x35   : > { %v151_v16 = vshrl.u32 %v150_v15, 9 }
  0x36   : > { %v226_v20 = vcvt.s32.f32 %v225_v19 }
  0x37   : > { %v152_v17 = vcvt.s32.f32 %v151_v16 }
  0x38   : > { %v227_v21 = vadd.f32 0.5, %v226_v20 }
  0x39   : > { %v153_v18 = vadd.f32 0.5, %v152_v17 }
  0x3a   : > { %v228_v22 = vmul.f32 1.1920929e-07, %v227_v21 }
  0x3b   : > { %v154_v19 = vmul.f32 1.1920929e-07, %v153_v18 }
  0x3c   : > { %v378_v23 = vadd.f32 -0.5, %v228_v22 }
  0x3d   : > { %v616_v20 = vadd.f32 -0.5, %v154_v19 }
  0x3e   : > { %v230_v24 = vand.u32 2147483647, %v378_v23  ;;  %v231_v26 = vmul.f32 %v378_v23, %v378_v23  ;;  %vm273_vm1 = vcmp.lt.f32.partialorder %v378_v23, 0.0 }
  0x3f   : > { %v156_v21 = vand.u32 2147483647, %v616_v20  ;;  %vm199_vm4 = vcmp.lt.f32.partialorder %v616_v20, 0.0 }
  0x40   : > { %v249_v25 = vsub.f32 0.5, %v230_v24  ;;  %v238_v28 = vmul.f32 3.130829, %v231_v26  ;;  %v232_v37 = vmul.f32 -25.441061, %v231_v26 }
  0x41   : > { %vm271_vm0 = vcmp.lt.f32.partialorder %v230_v24, 0.42  ;;  %v175_v22 = vsub.f32 0.5, %v156_v21  ;;  %vm197_vm3 = vcmp.lt.f32.partialorder %v156_v21, 0.42 }
  0x42   : > { %431 = vlog2.f32 %v249_v25  ;;  %v239_v31 = vadd.f32 -21.06224, %v238_v28  ;;  %v233_v41 = vadd.f32 41.391197, %v232_v37 }
  0x44   : > { %v240_v32 = vmul.f32 %v239_v31, %v231_v26  ;;  %v234_v45 = vmul.f32 %v233_v41, %v231_v26 }
  0x46   : > { %v241_v33 = vadd.f32 23.083368, %v240_v32  ;;  %v235_v49 = vadd.f32 -18.615, %v234_v45 }
  0x48   : > { %v242_v34 = vmul.f32 %v241_v33, %v231_v26  ;;  %v236_v52 = vmul.f32 %v235_v49, %v231_v26 }
  0x4a   : > { %v243_v38 = vadd.f32 -8.473511, %v242_v34  ;;  %v237_v55 = vadd.f32 2.5066283, %v236_v52 }
  0x4c   : > { %v244_v42 = vmul.f32 %v243_v38, %v231_v26  ;;  %v246_v58 = vmul.f32 %v237_v55, %v230_v24 }
  0x4e   : > { %v245_v46 = vadd.f32 1.0, %v244_v42 }
  0x4f   : > { %v432_v27 = vpop.eup %431 }
  0x50   : > { %v251_v29 = vmul.f32 0.6931472, %v432_v27 }
  0x52   : > { %v252_v30 = vsub.f32 0.0, %v251_v29  ;;  %v157_v29 = vmul.f32 %v616_v20, %v616_v20 }
  0x54   : > { %433 = vlog2.f32 %v252_v30  ;;  %v164_v31 = vmul.f32 3.130829, %v157_v29  ;;  %v158_v49 = vmul.f32 -25.441061, %v157_v29 }
  0x55   : > { %435 = vrcp.f32 %v245_v46 }
  0x56   : > { %437 = vlog2.f32 %v175_v22  ;;  %v165_v33 = vadd.f32 -21.06224, %v164_v31 }
  0x61   : > { %v434_v35 = vpop.eup %433 }
  0x62   : > { %v254_v36 = vmul.f32 0.6931472, %v434_v35  ;;  %v436_v60 = vpop.eup %435  ;;  %v166_v35 = vmul.f32 %v165_v33, %v157_v29 }
  0x63   : > { %v248_v62 = vmul.f32 %v436_v60, %v246_v58  ;;  %v438_v23 = vpop.eup %437 }
  0x64   : > { %v255_v39 = vmul.f32 3.960315e-07, %v254_v36  ;;  %v177_v6 = vmul.f32 0.6931472, %v438_v23  ;;  %v167_v37 = vadd.f32 23.083368, %v166_v35 }
  0x66   : > { %v256_v40 = vadd.f32 2.8881675e-07, %v255_v39  ;;  %v178_v24 = vsub.f32 0.0, %v177_v6 }
  0x68   : > { %v257_v43 = vmul.f32 %v256_v40, %v254_v36  ;;  %439 = vlog2.f32 %v178_v24  ;;  %v168_v40 = vmul.f32 %v167_v37, %v157_v29 }
  0x6a   : > { %v258_v44 = vadd.f32 3.2176787e-05, %v257_v43  ;;  %v169_v43 = vadd.f32 -8.473511, %v168_v40 }
  0x6c   : > { %v259_v47 = vmul.f32 %v258_v44, %v254_v36  ;;  %v170_v45 = vmul.f32 %v169_v43, %v157_v29 }
  0x6e   : > { %v260_v48 = vadd.f32 0.00039518965, %v259_v47  ;;  %v171_v47 = vadd.f32 1.0, %v170_v45 }
  0x70   : > { %v261_v50 = vmul.f32 %v260_v48, %v254_v36 }
  0x72   : > { %v262_v51 = vadd.f32 0.003840573, %v261_v50 }
  0x74   : > { %v263_v53 = vmul.f32 %v262_v51, %v254_v36  ;;  %v159_v51 = vadd.f32 41.391197, %v158_v49 }
  0x75   : > { %v440_v28 = vpop.eup %439 }
  0x76   : > { %v264_v54 = vadd.f32 0.027643882, %v263_v53  ;;  %v180_v30 = vmul.f32 0.6931472, %v440_v28  ;;  %v160_v53 = vmul.f32 %v159_v51, %v157_v29 }
  0x78   : > { %v265_v56 = vmul.f32 %v264_v54, %v254_v36  ;;  %v181_v32 = vmul.f32 3.960315e-07, %v180_v30  ;;  %v161_v55 = vadd.f32 -18.615, %v160_v53 }
  0x7a   : > { %v266_v57 = vadd.f32 0.16079797, %v265_v56  ;;  %v182_v34 = vadd.f32 2.8881675e-07, %v181_v32 }
  0x7c   : > { %v267_v59 = vmul.f32 %v266_v57, %v254_v36  ;;  %v162_v57 = vmul.f32 %v161_v55, %v157_v29 }
  0x7e   : > { %v268_v61 = vadd.f32 0.976169, %v267_v59  ;;  %v163_v59 = vadd.f32 2.5066283, %v162_v57 }
  0x80   : > { %v269_v63 = vmul.f32 %v268_v61, %v254_v36  ;;  %v183_v36 = vmul.f32 %v182_v34, %v180_v30  ;;  %v172_v61 = vmul.f32 %v163_v59, %v156_v21 }
  0x82   : > { %v270_v0 = vadd.f32 0.33747548, %v269_v63  ;;  %v184_v38 = vadd.f32 3.2176787e-05, %v183_v36 }
  0x84   : > { %v272_v1 = vsel %vm271_vm0, %v248_v62, %v270_v0  ;;  %v185_v41 = vmul.f32 %v184_v38, %v180_v30 }
  0x85   : > { %v274_v2 = vsub.f32 0.0, %v272_v1 }
  0x86   : > { %v186_v44 = vadd.f32 0.00039518965, %v185_v41 }
  0x87   : > { %v275_v3 = vsel %vm273_vm1, %v274_v2, %v272_v1 }
  0x88   : > { %v277_v4 = vsel %vm276_vm2, %v275_v3, -inf  ;;  %v187_v46 = vmul.f32 %v186_v44, %v180_v30 }
  0x89   : > { %278 = vmax.xlane.f32.xlu0 %v277_v4 }
  0x8a   : > { %v188_v48 = vadd.f32 0.003840573, %v187_v46 }
  0x8c   : > { %v189_v50 = vmul.f32 %v188_v48, %v180_v30 }
  0x8e   : > { %v190_v52 = vadd.f32 0.027643882, %v189_v50 }
  0x90   : > { %v191_v54 = vmul.f32 %v190_v52, %v180_v30 }
  0x92   : > { %v192_v56 = vadd.f32 0.16079797, %v191_v54 }
  0x94   : > { %v193_v58 = vmul.f32 %v192_v56, %v180_v30 }
  0x96   : > { %v194_v60 = vadd.f32 0.976169, %v193_v58 }
  0x98   : > { %v195_v62 = vmul.f32 %v194_v60, %v180_v30 }
  0x9a   : > { %v196_v1 = vadd.f32 0.33747548, %v195_v62 }
 0x112   : > { %v279_v25 = vpop.xlane.xlu0 %278 }
 0x113   : > { %v280_v26 = vsub.f32 %v275_v3, %v279_v25 }
 0x115   : > { %v281_v27 = vmul.f32 1.442695, %v280_v26 }
 0x117   : > { %441 = vpow2.f32 %v281_v27 }
 0x118   : > { %443 = vrcp.f32 %v171_v47 }
 0x124   : > { %v621_v39 = vpop.eup %441 }
 0x125   : > { %v283_v42 = vsel %vm276_vm2, %v621_v39, 0.0  ;;  %v444_v63 = vpop.eup %443 }
 0x126   : > { %284 = vadd.xlane.f32.xlu0 %v283_v42  ;;  %v174_v0 = vmul.f32 %v444_v63, %v172_v61 }
 0x128   : > { %v198_v2 = vsel %vm197_vm3, %v174_v0, %v196_v1 }
 0x129   : > { %v200_v3 = vsub.f32 0.0, %v198_v2 }
 0x12b   : > { %v201_v4 = vsel %vm199_vm4, %v200_v3, %v198_v2 }
 0x12c   : > { %203 = vst.msk [vmem:[%s119_s25] sm:$0xff] %vm202_vm5, %v201_v4 }
 0x12d   : > { %460 = shalt.err (!%p457_p3)
}
 0x12e   : > { %s461_s7 = scalar_lea.hbm %s631_s29, 128  ;;  %s465_s10 = scalar_lea.hbm %s680_s1, 256 }
 0x12f   : > { %p462_p4 = scmp.ne.s32.totalorder %s631_s29, %s461_s7  ;;  %p466_p9 = scmp.lt.s32.totalorder %s631_s29, %s680_s1 }
 0x130   : > { %p467_p10 = scmp.lt.s32.totalorder %s465_s10, %s461_s7 }
 0x131   : > { %p463_p7 = pnand %p462_p4, %p597_p5 }
 0x132   : > { %p468_p11 = por %p467_p10, %p466_p9 }
 0x133   : > { %p464_p8 = pneg %p463_p7 }
 0x135   : > { %p469_p12 = pnand %p468_p11, %p464_p8 }
 0x137   : > { %472 = shalt.err (!%p469_p12)
}
 0x138   : > { %385 = dma.vmem_to_hbm [thread:$0]  (%p597_p5), %s304_s26, 128, %s631_s29, %s290_s30  }
 0x139   : > { %s538_s18 = smov [#allocation5]  }
 0x13a   : > { %s314_s22 = sshll.u32 %s538_s18, 4  ;;  %s315_s22 = int_to_ptr.vmem [resolvable:$true] %s314_s22 }
 0x13b   : > { %s473_s23 = scalar_lea.vmem %s315_s22, 32  ;;  %p480_p3 = scmp.lt.s32.totalorder %s315_s22, %s315_s22 }
 0x13c   : > { %p474_p13 = scmp.ne.s32.totalorder %s315_s22, %s473_s23  ;;  %p481_p4 = scmp.lt.s32.totalorder %s473_s23, %s473_s23 }
 0x13e   : > { %p475_p0 = pnand %p474_p13, %p57_p2  ;;  %p482_p7 = por %p481_p4, %p480_p3 }
 0x140   : > { %p476_p1 = pneg %p475_p0 }
 0x142   : > { %p483_p8 = pnand %p482_p7, %p476_p1 }
 0x1af   : > { %v285_v5 = vpop.xlane.xlu0 %284 }
 0x1b0   : > { %445 = vrcp.f32 %v285_v5 }
 0x1bd   : > { %v446_v7 = vpop.eup %445 }
 0x1be   : > { %v287_v8 = vmul.f32 %v446_v7, %v621_v39 }
 0x1c0   : > { %288 = vst.msk [vmem:[#allocation5] sm:$0x3] %vm276_vm2, %v287_v8 }
 0x1c1   : > { %486 = shalt.err (!%p483_p8)
}
 0x1c2   : > { %387 = dma.vmem_to_hbm [thread:$0]  (%p57_p2), %s315_s22, 32, %s681_s2, [#allocation6]  }
 0x1c3   : > { %514 = dma.done.wait (%p57_p2), [#allocation6], 32  }
 0x1c4   : > { %516 = vsyncadd (%p57_p2), [#allocation6], 4294967264 }
 0x1c5 PF: > { %p397_p5 = scmp.ge.s32.totalorder %s535_s14, 2  ;;  %s330_s25 = sand.u32 1, %s523_s11  }
 0x1c6   : > { %s331_s26 = scalar_lea.sflag [#allocation4], %s330_s25 }
 0x1c7   : > { %p392_p9 = pnand %p397_p5, %p601_p6 }
 0x1c9   : > { %p393_p10 = pneg %p392_p9 }
 0x1cb   : > { %518 = dma.done.wait (%p393_p10), %s331_s26, 128  }
 0x1cc   : > { %520 = vsyncadd (%p393_p10), %s331_s26, 4294967168  ;;  %p15_p11 = scmp.ge.s32.totalorder %s582_s16, 4   ;;  %s684_s11 = smov %s527_s12 }
 0x1cd   : > { %s685_s12 = smov %s531_s13  ;;  %s686_s13 = smov %s593_s19 }
 0x1ce   : > { %s687_s14 = smov %s582_s16  ;;  %17 = sbr.rel (!%p15_p11) target bundleno = 6 (0x6), region = 64 }
 0x1d3   :  { %336 = vsyncpa [#allocation4], 1 }
 0x1d4   :  { %338 = vsyncpa [#allocation4 + $0x1], 1 }
 0x1d5   :  { %339 = vsyncpa [#allocation6], 1 }

</bundles_post_ra>
